<compile_context>
chip_gen: v6e
topology: v6e:2x2x1
jax: 0.10.0
libtpu: 0.0.40
codegen_flags: <defaults>
</compile_context>

<pallas_src>
import functools

import jax
import jax.numpy as jnp
from jax.experimental import pallas as pl
from jax.experimental.pallas import tpu as pltpu


def _rup(x, m):
    return ((x + m - 1) // m) * m


def _perm_right(n, s):
    """P_c (n, n) with (A @ P_c)[:, s2*(n//s) + w] = A[:, s*w + s2]."""
    j = jnp.arange(n)
    src = s * (j % (n // s)) + j // (n // s)
    return (jnp.arange(n)[:, None] == src[None, :]).astype(jnp.float32)


def _vmem_budgets():
    """(accounted-block budget, requested scoped-VMEM limit) in bytes."""
    try:
        cap = int(pltpu.get_tpu_info().vmem_capacity_bytes)
    except Exception:
        cap = 64 << 20                              # conservative: v7x per-TC VMEM
    budget = min(int(0.40 * cap), 28 << 20)         # what _tile_footprint may use
    limit = min(int(0.75 * cap), 96 << 20)          # scoped-VMEM ceiling we request
    return budget, limit


def _tile_footprint(th, c, w, s, itemsize):
    """Per-grid-step VMEM bytes for row tile `th`, incl. (8,128) layout padding."""
    wo = w // s
    in_b = c * _rup(th, 8) * _rup(s * w, 128) * itemsize           # input block
    out_b = c * s * s * _rup(th, 8) * _rup(wo, 128) * itemsize      # output block
    pc_b = _rup(w, 8) * _rup(w, 128) * itemsize                     # resident P_c
    q_b = s * c * _rup(th, 8) * _rup(w, 128) * 4                    # f32 temporaries
    return 2 * in_b + 2 * out_b + 2 * pc_b + q_b                    # x2: double-buffered


def _choose_row_tile(h_out, c, w, s, itemsize, n_batch, budget):
    # When N == 1, keep >= 2 row tiles so both TensorCores (v7x) get work.
    cap = h_out if (n_batch > 1 or h_out < 16) else h_out // 2
    cands = list(range(8, cap + 1, 8)) or [cap]     # multiples of 8 (sublane tile)
    fitting = [t for t in cands if _tile_footprint(t, c, w, s, itemsize) <= budget]
    if not fitting:
        fitting = [cands[0]]                        # smallest tile if budget is tight
    divisors = [t for t in fitting if h_out % t == 0]
    # Prefer an even division; otherwise use a ragged last tile (Pallas masks it).
    return max(divisors) if divisors else max(fitting)


def _contract_kernel(x_ref, pc_ref, o_ref, *, gain, n_c, th, w, prec):
    s = gain
    wo = w // s
    xb = x_ref[0]                                   # (C, TH, s*W)
    pc = pc_ref[...]                                # (W, W) 0/1 lane-permutation matrix
    for s1 in range(s):
        rows = xb[:, :, s1 * w:(s1 + 1) * w]        # (C, TH, W): rows with parity s1
        rows2d = rows.reshape(n_c * th, w)          # merge leading dims (TH mult of 8)
        # TODO(synk): for 16-bit dtypes with s == 2, replace this matmul with the
        # u32 bitcast pair-packing (shift/mask) lane de-interleave so huge-W cases
        # stay strictly memory-bound.
        q = jnp.dot(rows2d, pc, precision=prec,
                    preferred_element_type=jnp.float32)   # lanes now (s2-major, w)
        for s2 in range(s):
            oc0 = (s1 * s + s2) * n_c
            blk = q[:, s2 * wo:(s2 + 1) * wo].reshape(n_c, th, wo)
            o_ref[0, oc0:oc0 + n_c, :, :] = blk.astype(o_ref.dtype)


def contract(x, gain=2):
    n, c, h, w = x.shape
    s = gain
    assert h % s == 0 and w % s == 0, "H and W must be divisible by gain"
    h_out, w_out = h // s, w // s

    budget, vmem_limit = _vmem_budgets()
    th = _choose_row_tile(h_out, c, w, s, x.dtype.itemsize, n, budget)
    n_tiles = pl.cdiv(h_out, th)

    # Free, contiguous view: x_r[n, c, h, s1*W + w] = x[n, c, s*h + s1, w].
    x_r = x.reshape(n, c, h_out, s * w)
    pc = _perm_right(w, s).astype(x.dtype)

    prec = (jax.lax.Precision.HIGHEST if x.dtype == jnp.float32
            else jax.lax.Precision.DEFAULT)

    kernel = functools.partial(_contract_kernel, gain=s, n_c=c, th=th, w=w,
                               prec=prec)
    return pl.pallas_call(
        kernel,
        out_shape=jax.ShapeDtypeStruct((n, c * s * s, h_out, w_out), x.dtype),
        grid=(n, n_tiles),
        in_specs=[
            pl.BlockSpec((1, c, th, s * w), lambda i, t: (i, 0, t, 0)),  # NCHW slab
            pl.BlockSpec((w, w), lambda i, t: (0, 0)),                   # resident P_c
        ],
        out_specs=pl.BlockSpec((1, c * s * s, th, w_out),
                               lambda i, t: (i, 0, t, 0)),
        compiler_params=pltpu.CompilerParams(
            dimension_semantics=("parallel", "parallel"),
            vmem_limit_bytes=vmem_limit),
    )(x_r, pc)


def _contract_ref(x, gain=2):
    n, c, h, w = x.shape
    s = gain
    y = x.reshape(n, c, h // s, s, w // s, s)
    y = jnp.transpose(y, (0, 3, 5, 1, 2, 4))
    return y.reshape(n, c * s * s, h // s, w // s)


if __name__ == "__main__":
    key = jax.random.PRNGKey(0)
    # NCHW input matching the PyTorch module.  Values are snapped to
    # bf16-representable f32 so the 0/1-matrix lane permute is bitwise exact
    # under every MXU pass mode (the op itself is pure data movement).
    x = jax.random.normal(key, (2, 4, 16, 16), jnp.float32)
    x = x.astype(jnp.bfloat16).astype(jnp.float32)

    out = contract(x, gain=2)
    out = jax.block_until_ready(out)

    ref = _contract_ref(x, gain=2)
    assert out.shape == (2, 16, 8, 8), out.shape
    assert jnp.allclose(out, ref, rtol=0.0, atol=1e-6), float(
        jnp.max(jnp.abs(out - ref)))
    print("KERNEL_OK")
</pallas_src>

<mosaic_0001>
module attributes {stable_mosaic.version = 11 : i64} {
  func.func @_contract_kernel(%arg0: i32, %arg1: i32, %arg2: memref<1x4x8x32xf32, #tpu.memory_space<vmem>>, %arg3: memref<16x16xf32, #tpu.memory_space<vmem>>, %arg4: memref<1x16x8x8xf32, #tpu.memory_space<vmem>>) attributes {dimension_semantics = [#tpu.dimension_semantics<parallel>, #tpu.dimension_semantics<parallel>], iteration_bounds = array<i64: 2, 1>, scalar_prefetch = 0 : i64, scratch_operands = 0 : i64, tpu.core_type = #tpu.core_type<tc>, window_params = [{transform_indices = @transform_0, window_bounds = array<i64: 1, 4, 8, 32>}, {pipeline_mode = #tpu.pipeline_mode<synchronous>, transform_indices = @transform_1, window_bounds = array<i64: 16, 16>}, {transform_indices = @transform_2, window_bounds = array<i64: 1, 16, 8, 8>}]} {
    %c0 = arith.constant 0 : index
    %c0_0 = arith.constant 0 : index
    %c0_1 = arith.constant 0 : index
    %c0_2 = arith.constant 0 : index
    %0 = vector.load %arg2[%c0, %c0_0, %c0_1, %c0_2] : memref<1x4x8x32xf32, #tpu.memory_space<vmem>>, vector<1x4x8x32xf32>
    %1 = vector.shape_cast %0 : vector<1x4x8x32xf32> to vector<4x8x32xf32>
    %c0_3 = arith.constant 0 : index
    %c0_4 = arith.constant 0 : index
    %2 = vector.load %arg3[%c0_3, %c0_4] : memref<16x16xf32, #tpu.memory_space<vmem>>, vector<16x16xf32>
    %3 = vector.extract_strided_slice %1 {offsets = [0, 0, 0], sizes = [4, 8, 16], strides = [1, 1, 1]} : vector<4x8x32xf32> to vector<4x8x16xf32>
    %4 = vector.shape_cast %3 : vector<4x8x16xf32> to vector<32x16xf32>
    %cst = arith.constant dense<0.000000e+00> : vector<32x16xf32>
    %5 = tpu.matmul %4, %2, %cst {dimension_numbers = #tpu.dot_dimension_numbers<[1], [0], [0], [1], [0, 0, 1, 1], [], []>, precision = #tpu.contract_precision<fp32>} : vector<32x16xf32>, vector<16x16xf32>, vector<32x16xf32> -> vector<32x16xf32>
    %6 = vector.extract_strided_slice %5 {offsets = [0, 0], sizes = [32, 8], strides = [1, 1]} : vector<32x16xf32> to vector<32x8xf32>
    %7 = vector.shape_cast %6 : vector<32x8xf32> to vector<4x8x8xf32>
    %c0_5 = arith.constant 0 : index
    %c0_6 = arith.constant 0 : index
    %c0_7 = arith.constant 0 : index
    %c0_8 = arith.constant 0 : index
    %8 = vector.load %arg4[%c0_5, %c0_6, %c0_7, %c0_8] : memref<1x16x8x8xf32, #tpu.memory_space<vmem>>, vector<1x4x8x8xf32>
    %9 = vector.shape_cast %8 : vector<1x4x8x8xf32> to vector<4x8x8xf32>
    %10 = vector.shape_cast %7 : vector<4x8x8xf32> to vector<1x4x8x8xf32>
    tpu.vector_store %arg4[%c0_5, %c0_6, %c0_7, %c0_8], %10 {strides = array<i32>} : memref<1x16x8x8xf32, #tpu.memory_space<vmem>>, vector<1x4x8x8xf32>,
    %11 = vector.extract_strided_slice %5 {offsets = [0, 8], sizes = [32, 8], strides = [1, 1]} : vector<32x16xf32> to vector<32x8xf32>
    %12 = vector.shape_cast %11 : vector<32x8xf32> to vector<4x8x8xf32>
    %c0_9 = arith.constant 0 : index
    %c4 = arith.constant 4 : index
    %c0_10 = arith.constant 0 : index
    %c0_11 = arith.constant 0 : index
    %13 = vector.load %arg4[%c0_9, %c4, %c0_10, %c0_11] : memref<1x16x8x8xf32, #tpu.memory_space<vmem>>, vector<1x4x8x8xf32>
    %14 = vector.shape_cast %13 : vector<1x4x8x8xf32> to vector<4x8x8xf32>
    %15 = vector.shape_cast %12 : vector<4x8x8xf32> to vector<1x4x8x8xf32>
    tpu.vector_store %arg4[%c0_9, %c4, %c0_10, %c0_11], %15 {strides = array<i32>} : memref<1x16x8x8xf32, #tpu.memory_space<vmem>>, vector<1x4x8x8xf32>,
    %16 = vector.extract_strided_slice %1 {offsets = [0, 0, 16], sizes = [4, 8, 16], strides = [1, 1, 1]} : vector<4x8x32xf32> to vector<4x8x16xf32>
    %17 = vector.shape_cast %16 : vector<4x8x16xf32> to vector<32x16xf32>
    %cst_12 = arith.constant dense<0.000000e+00> : vector<32x16xf32>
    %18 = tpu.matmul %17, %2, %cst_12 {dimension_numbers = #tpu.dot_dimension_numbers<[1], [0], [0], [1], [0, 0, 1, 1], [], []>, precision = #tpu.contract_precision<fp32>} : vector<32x16xf32>, vector<16x16xf32>, vector<32x16xf32> -> vector<32x16xf32>
    %19 = vector.extract_strided_slice %18 {offsets = [0, 0], sizes = [32, 8], strides = [1, 1]} : vector<32x16xf32> to vector<32x8xf32>
    %20 = vector.shape_cast %19 : vector<32x8xf32> to vector<4x8x8xf32>
    %c0_13 = arith.constant 0 : index
    %c8 = arith.constant 8 : index
    %c0_14 = arith.constant 0 : index
    %c0_15 = arith.constant 0 : index
    %21 = vector.load %arg4[%c0_13, %c8, %c0_14, %c0_15] : memref<1x16x8x8xf32, #tpu.memory_space<vmem>>, vector<1x4x8x8xf32>
    %22 = vector.shape_cast %21 : vector<1x4x8x8xf32> to vector<4x8x8xf32>
    %23 = vector.shape_cast %20 : vector<4x8x8xf32> to vector<1x4x8x8xf32>
    tpu.vector_store %arg4[%c0_13, %c8, %c0_14, %c0_15], %23 {strides = array<i32>} : memref<1x16x8x8xf32, #tpu.memory_space<vmem>>, vector<1x4x8x8xf32>,
    %24 = vector.extract_strided_slice %18 {offsets = [0, 8], sizes = [32, 8], strides = [1, 1]} : vector<32x16xf32> to vector<32x8xf32>
    %25 = vector.shape_cast %24 : vector<32x8xf32> to vector<4x8x8xf32>
    %c0_16 = arith.constant 0 : index
    %c12 = arith.constant 12 : index
    %c0_17 = arith.constant 0 : index
    %c0_18 = arith.constant 0 : index
    %26 = vector.load %arg4[%c0_16, %c12, %c0_17, %c0_18] : memref<1x16x8x8xf32, #tpu.memory_space<vmem>>, vector<1x4x8x8xf32>
    %27 = vector.shape_cast %26 : vector<1x4x8x8xf32> to vector<4x8x8xf32>
    %28 = vector.shape_cast %25 : vector<4x8x8xf32> to vector<1x4x8x8xf32>
    tpu.vector_store %arg4[%c0_16, %c12, %c0_17, %c0_18], %28 {strides = array<i32>} : memref<1x16x8x8xf32, #tpu.memory_space<vmem>>, vector<1x4x8x8xf32>,
    return
  }
  func.func @transform_0(%arg0: i32, %arg1: i32) -> (i32, i32, i32, i32) {
    %c0_i32 = arith.constant 0 : i32
    %c0_i32_0 = arith.constant 0 : i32
    %c0_i32_1 = arith.constant 0 : i32
    return %arg0, %c0_i32, %arg1, %c0_i32_0 : i32, i32, i32, i32
  }
  func.func @transform_1(%arg0: i32, %arg1: i32) -> (i32, i32) {
    %c0_i32 = arith.constant 0 : i32
    %c0_i32_0 = arith.constant 0 : i32
    %c0_i32_1 = arith.constant 0 : i32
    return %c0_i32, %c0_i32_0 : i32, i32
  }
  func.func @transform_2(%arg0: i32, %arg1: i32) -> (i32, i32, i32, i32) {
    %c0_i32 = arith.constant 0 : i32
    %c0_i32_0 = arith.constant 0 : i32
    %c0_i32_1 = arith.constant 0 : i32
    return %arg0, %c0_i32, %arg1, %c0_i32_0 : i32, i32, i32, i32
  }
}

</mosaic_0001>

<bundles_post_ra>
// kernel: tpu_custom_call.1
= control target key start
LH: loop header
LB: loop body
LE: loop exit
PB: predicated region body
PF: predicated region fallthrough
CT: control target
= control target key end

     0   :  { %7 = vsyncpa [#allocation3], 0  ;;  %s2254_s0 = inlined_call_operand.hbm [shape: f32[2,4,8,32], index: 0, kind: input, shape index: {}]   ;;  %s2255_s1 = inlined_call_operand.hbm [shape: f32[16,16], index: 1, kind: input, shape index: {}]   ;;  %s2256_s2 = inlined_call_operand.vmem [shape: f32[2,16,8,8], index: 2, kind: output, shape index: {}]  }
   0x1   :  { %9 = vsyncpa [#allocation3 + $0x1], 0 }
   0x2   :  { %10 = vsyncpa [#allocation5], 0  ;;  %s1988_s9 = smov 0   ;;  %s1990_s10 = smov 0  }
   0x3   :  { %s1992_s11 = smov 0   ;;  %s1994_s12 = smov 0  }
   0x4   :  { %s1996_s13 = smov 0   ;;  %s1998_s14 = smov 0  }
   0x5 LB: > { %s1566_s15 = sadd.s32 4294967295, %s1965_s14   ;;  %p50_p0 = scmp.ne.s32.totalorder %s1949_s10, %s1945_s9  ;;  %s1965_s14 = sphi %s1998_s14, %s16_s14   ;;  %s1961_s13 = sphi %s1996_s13, %s2266_s13   ;;  %s1957_s12 = sphi %s1994_s12, %s2265_s12   ;;  %s1953_s11 = sphi %s1992_s11, %s2264_s11   ;;  %s1949_s10 = sphi %s1990_s10, %s2263_s10   ;;  %s1945_s9 = sphi %s1988_s9, %s2262_s9  }
   0x6   : > { %p2018_p1 = scmp.eq.s32.totalorder %s1566_s15, 0  ;;  %p1568_p2 = scmp.ge.s32.totalorder %s1965_s14, 1 }
   0x7   : > { %p110_p3 = scmp.lt.s32.totalorder %s1965_s14, 3  ;;  %s1967_s19 = smov [#allocation4]  }
   0x8   : > { %p2026_p4 = por %p2018_p1, %p50_p0  ;;  %s122_s20 = sshll.u32 %s1967_s19, 4  ;;  %s123_s20 = int_to_ptr.vmem [resolvable:$true] %s122_s20 }
   0x9   : > { %p2030_p5 = pnand %p1568_p2, %p110_p3  ;;  %s28_s22 = sadd.s32 1, %s1961_s13 }
   0xa   : > { %s1868_s23 = scalar_lea.vmem %s123_s20, 256  ;;  %p1876_p12 = scmp.lt.s32.totalorder %s123_s20, %s123_s20 }
   0xb   : > { %p1793_p6 = pneg %p2030_p5  ;;  %p1869_p9 = scmp.ne.s32.totalorder %s123_s20, %s1868_s23 }
   0xc   : > { %p1877_p13 = scmp.lt.s32.totalorder %s1868_s23, %s1868_s23 }
   0xd   : > { %p2038_p7 = pnand %p1793_p6, %p2018_p1 }
   0xe   : > { %p1878_p0 = por %p1877_p13, %p1876_p12 }
   0xf   : > { %p1859_p8 = pneg %p2038_p7 }
  0x11   : > { %p1871_p10 = pnand %p1869_p9, %p1859_p8 }
  0x13   : > { %p1872_p11 = pneg %p1871_p10 }
  0x15   : > { %p1879_p2 = pnand %p1878_p0, %p1872_p11 }
  0x17   : > { %1882 = shalt.err (!%p1879_p2)
}
  0x18   : > { %s1968_s24 = smov 128   ;;  %s1969_s25 = smov 8  }
  0x19   : > { %1796 = dma.hbm_to_vmem [thread:$0]  (!%p2038_p7), %s2255_s1, 256, %s123_s20, [#allocation5], %s1968_s24, %s1968_s24, %s1969_s25  }
  0x1a   : > { %p30_p3 = scmp.ge.s32.totalorder %s28_s22, 2  ;;  %s37_s28 = sadd.s32 1, %s1953_s11 }
  0x1b   : > { %p44_p6 = scmp.ne.s32.totalorder %s1953_s11, %s1949_s10  ;;  %p45_p8 = scmp.eq.s32.totalorder %s1965_s14, 0 }
  0x1c   : > { %s2268_s22 = smov (%p30_p3, %s28_s22), 0  ;;  %p1802_p10 = scmp.lt.s32.totalorder %s1965_s14, 2 }
  0x1d   : > { %p46_p9 = por %p45_p8, %p44_p6  ;;  %s32_s29 = ssub.s32 %s1961_s13, %s2268_s22 }
  0x1e   : > { %s136_s30 = sand.u32 1, %s1953_s11   ;;  %p35_p11 = scmp.eq.s32.totalorder %s32_s29, 0 }
  0x1f   : > { %s1571_s3 = sshll.u32 %s136_s30, 5  ;;  %s1593_s4 = sshll.u32 %s1961_s13, 9 }
  0x20   : > { %s2065_s5 = scalar_select %p35_p11, %s1953_s11, %s37_s28  }
  0x21   : > { %s147_s8 = scalar_lea.hbm %s2254_s0, %s1593_s4  ;;  %s140_s9 = scalar_lea.vmem [#allocation2], %s1571_s3 }
  0x22   : > { %s148_s15 = sshll.u32 %s140_s9, 4  ;;  %p2070_p7 = pnand %p1802_p10, %p46_p9  ;;  %s149_s15 = int_to_ptr.vmem [resolvable:$true] %s148_s15 }
  0x23   : > { %s137_s20 = scalar_lea.sflag [#allocation3], %s136_s30  ;;  %s1896_s21 = scalar_lea.vmem %s149_s15, 512 }
  0x24   : > { %p1885_p12 = pneg %p2070_p7  ;;  %p1897_p13 = scmp.ne.s32.totalorder %s149_s15, %s1896_s21 }
  0x25   : > { %s1970_s23 = smov [#allocation2]  }
  0x26   : > { %p1899_p0 = pnand %p1897_p13, %p1885_p12  ;;  %s1901_s26 = sshll.u32 %s1970_s23, 4  ;;  %s1902_s26 = int_to_ptr.vmem [resolvable:$false] %s1901_s26 }
  0x27   : > { %s1903_s27 = scalar_lea.vmem %s1902_s26, 1024  ;;  %p1904_p3 = scmp.lt.s32.totalorder %s149_s15, %s1902_s26 }
  0x28   : > { %p1900_p2 = pneg %p1899_p0  ;;  %p1905_p6 = scmp.lt.s32.totalorder %s1903_s27, %s1896_s21 }
  0x2a   : > { %p1906_p8 = por %p1905_p6, %p1904_p3 }
  0x2c   : > { %p1907_p9 = pnand %p1906_p8, %p1900_p2 }
  0x2e   : > { %1910 = shalt.err (!%p1907_p9)
}
  0x2f   : > { %1800 = dma.hbm_to_vmem [thread:$0]  (!%p2070_p7), %s147_s8, 512, %s149_s15, %s137_s20, %s1968_s24, %s1968_s24, %s1969_s25  }
  0x30   : > { %160 = sbr.rel (%p2030_p5) target bundleno = 522 (0x20a), region = 28  ;;  %s162_s28 = sand.u32 (!%p2030_p5), 1, %s1949_s10  }
  0x31   : > { %s1575_s29 = sshll.u32 (!%p2030_p5), %s162_s28, 5  ;;  %s163_s30 = scalar_lea.sflag (!%p2030_p5), [#allocation3], %s162_s28 }
  0x32   : > { %s166_s3 = scalar_lea.vmem (!%p2030_p5), [#allocation2], %s1575_s29 }
  0x35   : > { %1936 = dma.done.wait (%p2026_p4), %s163_s30, 512  }
  0x36   : > { %1938 = vsyncadd (%p2026_p4), %s163_s30, 4294966784 }
  0x37   : > { %1940 = dma.done.wait (%p2018_p1), [#allocation5], 256  }
  0x38   : > { %1942 = vsyncadd (%p2018_p1), [#allocation5], 4294967040  ;;  %vm208_vm0 = vcmask 130048   ;;  %v204_v0 = vld [vmem:[%s166_s3 + $0x10] sm:$0xff]  ;;  %v202_v1 = vld [vmem:[%s166_s3] sm:$0xff]  ;;  %s1971_s18 = smov 112  }
  0x39   : > { %v205_v2 = vld [vmem:[%s166_s3 + $0x18] sm:$0xff]  ;;  %839 = vrot.lane.b32.xlu1 %v204_v0, %s1971_s18  ;;  %v216_v3 = vsel %vm208_vm0, %v204_v0, 0  ;;  %835 = vrot.lane.b32.xlu0 %v202_v1, %s1971_s18  ;;  %v210_v4 = vsel %vm208_vm0, %v202_v1, 0  ;;  %v203_v6 = vld [vmem:[%s166_s3 + $0x8] sm:$0xff]  ;;  %v206_v8 = vld [vmem:[#allocation4] sm:$0xff]  ;;  %p194_p1 = scmp.lt.s32.totalorder %s1957_s12, 1 }
  0x3a   : > { %v219_v5 = vsel %vm208_vm0, %v205_v2, 0  ;;  %v207_v7 = vld [vmem:[#allocation4 + $0x8] sm:$0xff]  ;;  %v2095_v9 = vand.u32 4294901760, %v216_v3  ;;  %v2097_v10 = vand.u32 4294901760, %v210_v4  ;;  %v213_v12 = vsel %vm208_vm0, %v203_v6, 0 }
  0x3b   : > { %v2099_v11 = vand.u32 4294901760, %v219_v5  ;;  %v2102_v13 = vand.u32 4294901760, %v213_v12  ;;  %v2104_v14 = vand.u32 4294901760, %v207_v7  ;;  %v2106_v15 = vand.u32 4294901760, %v206_v8  ;;  %s2270_s12 = smov (!%p194_p1, %s1957_s12), 1 }
  0x3c   : > { %v309_v16 = vsub.f32 %v216_v3, %v2095_v9  ;;  %v289_v17 = vsub.f32 %v210_v4, %v2097_v10  ;;  %1681 = vmatprep.mubr.f32.mxu1 %v2097_v10  ;;  %s1594_s16 = sshll.u32 %s2270_s12, 7  ;;  %vm809_vm1 = vcmask 64512   ;;  %s1972_s12 = smov 120  }
  0x3d   : > { %v2111_v18 = vsub.f32 %v219_v5, %v2099_v11  ;;  %841 = vrot.lane.b32.xlu1 %v205_v2, %s1971_s18  ;;  %v299_v19 = vsub.f32 %v213_v12, %v2102_v13  ;;  %837 = vrot.lane.b32.xlu0 %v203_v6, %s1971_s18  ;;  %v2116_v20 = vsub.f32 %v207_v7, %v2104_v14  ;;  %s2194_s25 = scalar_lea.vmem %s2256_s2, %s1594_s16 }
  0x3e   : > { %v2119_v21 = vsub.f32 %v206_v8, %v2106_v15  ;;  %1667 = vmatprep.subr.mxu0 %v2104_v14  ;;  %v290_v22 = vand.u32 4294901760, %v289_v17  ;;  %v310_v23 = vand.u32 4294901760, %v309_v16 }
  0x3f   : > { %v320_v24 = vand.u32 4294901760, %v2111_v18  ;;  %1668 = vmatpush3.msra.mxu0 %v2104_v14  ;;  %v2125_v25 = vand.u32 4294901760, %v2116_v20  ;;  %v300_v26 = vand.u32 4294901760, %v299_v19 }
  0x40   : > { %v2128_v27 = vand.u32 4294901760, %v2119_v21  ;;  %1669 = vmatprep.subr.mxu0 %v2106_v15  ;;  %v291_v28 = vsub.f32 %v289_v17, %v290_v22  ;;  %v311_v29 = vsub.f32 %v309_v16, %v310_v23 }
  0x41   : > { %v360_v30 = vsub.f32 %v2116_v20, %v2125_v25  ;;  %1670 = vmatpush3.msra.mxu0 %v2106_v15  ;;  %v301_v31 = vsub.f32 %v299_v19, %v300_v26  ;;  %v321_v33 = vsub.f32 %v2111_v18, %v320_v24 }
  0x42   : > { %v367_v32 = vsub.f32 %v2119_v21, %v2128_v27  ;;  %v292_v34 = vand.u32 4294901760, %v291_v28  ;;  %v312_v35 = vand.u32 4294901760, %v311_v29  ;;  %1687 = vmatprep.subr.mxu0 %v2116_v20 }
  0x43   : > { %v361_v36 = vand.u32 4294901760, %v360_v30  ;;  %v302_v37 = vand.u32 4294901760, %v301_v31  ;;  %v322_v39 = vand.u32 4294901760, %v321_v33 }
  0x44   : > { %v368_v38 = vand.u32 4294901760, %v367_v32  ;;  %1671 = vmatprep.mubr.f32.mxu0 %v292_v34 }
  0x45   : > { %1677 = vmatprep.subr.mxu1 %v361_v36  ;;  %1672 = vmatmul.mubr.f32.vlgmr.msra.gmra.mxu0 %v302_v37 }
  0x46   : > { %1678 = vmatpush3.msra.mxu1 %v361_v36  ;;  %1674 = vmatprep.mubr.f32.mxu0 %v312_v35 }
  0x47   : > { %1679 = vmatprep.subr.mxu1 %v368_v38  ;;  %1688 = vmatpush3.msra.mxu0 %v2116_v20 }
  0x48   : > { %1680 = vmatpush3.msra.mxu1 %v368_v38  ;;  %1689 = vmatprep.subr.mxu0 %v2119_v21 }
  0x49   : > { %1682 = vmatmul.mubr.f32.vlgmr.msra.gmra.mxu1 %v2102_v13  ;;  %1675 = vmatmul.mubr.f32.gmra.mxu0 %v322_v39 }
  0x4a   : > { %1684 = vmatprep.mubr.f32.mxu1 %v2095_v9  ;;  %1697 = vmatprep.subr.mxu1 %v2104_v14 }
  0x4b   : > { %1690 = vmatpush3.msra.mxu0 %v2119_v21  ;;  %1691 = vmatprep.mubr.f32.mxu0 %v289_v17 }
  0x4c   : > { %1698 = vmatpush3.msra.mxu1 %v2104_v14  ;;  %1707 = vmatprep.subr.mxu0 %v2125_v25 }
  0x4d   : > { %1685 = vmatmul.mubr.f32.gmra.mxu1 %v2099_v11  ;;  %1692 = vmatmul.mubr.f32.vlgmr.msra.gmra.mxu0 %v299_v19 }
  0x4e   : > { %1699 = vmatprep.subr.mxu1 %v2106_v15  ;;  %1701 = vmatprep.mubr.f32.mxu1 %v290_v22 }
  0x4f   : > { %1700 = vmatpush3.msra.mxu1 %v2106_v15  ;;  %1694 = vmatprep.mubr.f32.mxu0 %v309_v16 }
  0x50   : > { %1708 = vmatpush3.msra.mxu0 %v2125_v25  ;;  %1717 = vmatprep.subr.mxu1 %v2104_v14 }
  0x51   : > { %1702 = vmatmul.mubr.f32.vlgmr.msra.gmra.mxu1 %v300_v26  ;;  %1695 = vmatmul.mubr.f32.gmra.mxu0 %v2111_v18 }
  0x52   : > { %1704 = vmatprep.mubr.f32.mxu1 %v310_v23  ;;  %1709 = vmatprep.subr.mxu0 %v2128_v27 }
  0x53   : > { %1710 = vmatpush3.msra.mxu0 %v2128_v27  ;;  %1711 = vmatprep.mubr.f32.mxu0 %v2097_v10 }
  0x54   : > { %1718 = vmatpush3.msra.mxu1 %v2104_v14  ;;  %1727 = vmatprep.subr.mxu0 %v2104_v14 }
  0x55   : > { %1705 = vmatmul.mubr.f32.gmra.mxu1 %v320_v24  ;;  %1712 = vmatmul.mubr.f32.vlgmr.msra.gmra.mxu0 %v2102_v13 }
  0x56   : > { %1719 = vmatprep.subr.mxu1 %v2106_v15  ;;  %1721 = vmatprep.mubr.f32.mxu1 %v2097_v10 }
  0x57   : > { %1720 = vmatpush3.msra.mxu1 %v2106_v15  ;;  %1714 = vmatprep.mubr.f32.mxu0 %v2095_v9 }
  0x58   : > { %1737 = vmatprep.subr.mxu1 %v361_v36  ;;  %1728 = vmatpush3.msra.mxu0 %v2104_v14 }
  0x59   : > { %1722 = vmatmul.mubr.f32.vlgmr.msra.gmra.mxu1 %v2102_v13  ;;  %1715 = vmatmul.mubr.f32.gmra.mxu0 %v2099_v11 }
  0x5a   : > { %1724 = vmatprep.mubr.f32.mxu1 %v2095_v9  ;;  %1738 = vmatpush3.msra.mxu1 %v361_v36 }
  0x5b   : > { %1739 = vmatprep.subr.mxu1 %v368_v38  ;;  %1729 = vmatprep.subr.mxu0 %v2106_v15 }
  0x5c   : > { %1740 = vmatpush3.msra.mxu1 %v368_v38  ;;  %1730 = vmatpush3.msra.mxu0 %v2106_v15 }
  0x5d   : > { %1725 = vmatmul.mubr.f32.gmra.mxu1 %v2099_v11  ;;  %1757 = vmatprep.subr.mxu1 %v2104_v14 }
  0x5e   : > { %1747 = vmatprep.subr.mxu0 %v2116_v20 }
  0xab   : > { %v840_v40 = vpop.permute.xlu1 %839  ;;  %v836_v41 = vpop.permute.xlu0 %835 }
  0xac   : > { %v847_v42 = vsel %vm208_vm0, %v840_v40, 0  ;;  %v843_v43 = vsel %vm208_vm0, %v836_v41, 0 }
  0xad   : > { %v938_v44 = vand.u32 4294901760, %v847_v42  ;;  %v918_v45 = vand.u32 4294901760, %v843_v43 }
  0xaf   : > { %v939_v46 = vsub.f32 %v847_v42, %v938_v44  ;;  %v919_v47 = vsub.f32 %v843_v43, %v918_v45  ;;  %v842_v48 = vpop.permute.xlu1 %841  ;;  %v838_v49 = vpop.permute.xlu0 %837  ;;  %1741 = vmatprep.mubr.f32.mxu1 %v918_v45 }
  0xb0   : > { %v849_v50 = vsel %vm208_vm0, %v842_v48, 0  ;;  %v845_v51 = vsel %vm208_vm0, %v838_v49, 0 }
  0xb1   : > { %v920_v52 = vand.u32 4294901760, %v919_v47  ;;  %v948_v53 = vand.u32 4294901760, %v849_v50  ;;  %v928_v54 = vand.u32 4294901760, %v845_v51  ;;  %v940_v55 = vand.u32 4294901760, %v939_v46 }
  0xb3   : > { %v949_v56 = vsub.f32 %v849_v50, %v948_v53  ;;  %v929_v57 = vsub.f32 %v845_v51, %v928_v54  ;;  %1742 = vmatmul.mubr.f32.vlgmr.msra.gmra.mxu1 %v928_v54  ;;  %v921_v58 = vsub.f32 %v919_v47, %v920_v52  ;;  %v941_v62 = vsub.f32 %v939_v46, %v940_v55 }
  0xb4   : > { %1744 = vmatprep.mubr.f32.mxu1 %v938_v44  ;;  %1758 = vmatpush3.msra.mxu1 %v2104_v14 }
  0xb5   : > { %v950_v59 = vand.u32 4294901760, %v949_v56  ;;  %v930_v60 = vand.u32 4294901760, %v929_v57  ;;  %v922_v61 = vand.u32 4294901760, %v921_v58  ;;  %1759 = vmatprep.subr.mxu1 %v2106_v15  ;;  %v942_v2 = vand.u32 4294901760, %v941_v62 }
  0xb6   : > { %1760 = vmatpush3.msra.mxu1 %v2106_v15 }
  0xb7   : > { %v931_v63 = vsub.f32 %v929_v57, %v930_v60  ;;  %1731 = vmatprep.mubr.f32.mxu0 %v922_v61  ;;  %1745 = vmatmul.mubr.f32.gmra.mxu1 %v948_v53  ;;  %v951_v1 = vsub.f32 %v949_v56, %v950_v59 }
  0xb8   : > { %1761 = vmatprep.mubr.f32.mxu1 %v920_v52  ;;  %1777 = vmatprep.subr.mxu1 %v2104_v14 }
  0xb9   : > { %v932_v0 = vand.u32 4294901760, %v931_v63  ;;  %v952_v3 = vand.u32 4294901760, %v951_v1 }
  0xbb   : > { %1732 = vmatmul.mubr.f32.vlgmr.msra.gmra.mxu0 %v932_v0  ;;  %1762 = vmatmul.mubr.f32.vlgmr.msra.gmra.mxu1 %v930_v60 }
  0xbc   : > { %1748 = vmatpush3.msra.mxu0 %v2116_v20  ;;  %1734 = vmatprep.mubr.f32.mxu0 %v942_v2 }
  0xbd   : > { %1764 = vmatprep.mubr.f32.mxu1 %v940_v55  ;;  %1749 = vmatprep.subr.mxu0 %v2119_v21 }
  0xbe   : > { %1750 = vmatpush3.msra.mxu0 %v2119_v21  ;;  %1778 = vmatpush3.msra.mxu1 %v2104_v14 }
  0xbf   : > { %1735 = vmatmul.mubr.f32.gmra.mxu0 %v952_v3  ;;  %1765 = vmatmul.mubr.f32.gmra.mxu1 %v950_v59 }
  0xc0   : > { %1751 = vmatprep.mubr.f32.mxu0 %v919_v47  ;;  %1781 = vmatprep.mubr.f32.mxu1 %v918_v45 }
  0xc1   : > { %1779 = vmatprep.subr.mxu1 %v2106_v15  ;;  %1767 = vmatprep.subr.mxu0 %v2125_v25 }
  0xc2   : > { %1780 = vmatpush3.msra.mxu1 %v2106_v15 }
  0xc3   : > { %1752 = vmatmul.mubr.f32.vlgmr.msra.gmra.mxu0 %v929_v57  ;;  %1782 = vmatmul.mubr.f32.vlgmr.msra.gmra.mxu1 %v928_v54 }
  0xc4   : > { %1768 = vmatpush3.msra.mxu0 %v2125_v25  ;;  %1754 = vmatprep.mubr.f32.mxu0 %v939_v46 }
  0xc5   : > { %1784 = vmatprep.mubr.f32.mxu1 %v938_v44  ;;  %1769 = vmatprep.subr.mxu0 %v2128_v27 }
  0xc6   : > { %1770 = vmatpush3.msra.mxu0 %v2128_v27 }
  0xc7   : > { %1755 = vmatmul.mubr.f32.gmra.mxu0 %v949_v56  ;;  %1785 = vmatmul.mubr.f32.gmra.mxu1 %v948_v53 }
  0xc8   : > { %1771 = vmatprep.mubr.f32.mxu0 %v918_v45 }
  0xcb   : > { %1772 = vmatmul.mubr.f32.vlgmr.msra.gmra.mxu0 %v928_v54 }
  0xcc   : > { %1774 = vmatprep.mubr.f32.mxu0 %v938_v44 }
  0xcf   : > { %1775 = vmatmul.mubr.f32.gmra.mxu0 %v948_v53 }
 0x105   : > { %v1673_v4 = vpop.f32.mrf.mxu0 }
 0x107   : > { %v294_v5 = vpop.f32.mrf.mxu0 }
 0x109   : > { %v1683_v6 = vpop.f32.mrf.mxu1  ;;  %v1676_v7 = vpop.f32.mrf.mxu0 }
 0x10a   : > { %v412_v8 = vadd.f32 %v1683_v6, %v1673_v4 }
 0x10b   : > { %v405_v9 = vpop.f32.mrf.mxu1  ;;  %v314_v10 = vpop.f32.mrf.mxu0 }
 0x10c   : > { %v406_v11 = vadd.f32 %v405_v9, %v294_v5 }
 0x10d   : > { %v1686_v12 = vpop.f32.mrf.mxu1  ;;  %v1693_v13 = vpop.f32.mrf.mxu0 }
 0x10e   : > { %v424_v14 = vadd.f32 %v1686_v12, %v1676_v7  ;;  %v507_v15 = vadd.f32 %v1693_v13, %v412_v8 }
 0x10f   : > { %v417_v16 = vpop.f32.mrf.mxu1  ;;  %v499_v17 = vpop.f32.mrf.mxu0 }
 0x110   : > { %v418_v18 = vadd.f32 %v417_v16, %v314_v10  ;;  %v500_v19 = vadd.f32 %v499_v17, %v406_v11 }
 0x111   : > { %v1703_v20 = vpop.f32.mrf.mxu1  ;;  %v1696_v21 = vpop.f32.mrf.mxu0 }
 0x112   : > { %v604_v22 = vadd.f32 %v1703_v20, %v507_v15  ;;  %v521_v23 = vadd.f32 %v1696_v21, %v424_v14 }
 0x113   : > { %v595_v24 = vpop.f32.mrf.mxu1  ;;  %v513_v25 = vpop.f32.mrf.mxu0 }
 0x114   : > { %v596_v26 = vadd.f32 %v595_v24, %v500_v19  ;;  %v514_v27 = vadd.f32 %v513_v25, %v418_v18 }
 0x115   : > { %v1706_v28 = vpop.f32.mrf.mxu1  ;;  %v1713_v29 = vpop.f32.mrf.mxu0 }
 0x116   : > { %v620_v30 = vadd.f32 %v1706_v28, %v521_v23  ;;  %v703_v31 = vadd.f32 %v1713_v29, %v604_v22 }
 0x117   : > { %v611_v32 = vpop.f32.mrf.mxu1  ;;  %v696_v33 = vpop.f32.mrf.mxu0 }
 0x118   : > { %v612_v34 = vadd.f32 %v611_v32, %v514_v27  ;;  %v697_v35 = vadd.f32 %v696_v33, %v596_v26 }
 0x119   : > { %v1723_v36 = vpop.f32.mrf.mxu1  ;;  %v1716_v37 = vpop.f32.mrf.mxu0 }
 0x11a   : > { %v794_v38 = vadd.f32 %v1723_v36, %v703_v31  ;;  %v715_v39 = vadd.f32 %v1716_v37, %v620_v30 }
 0x11b   : > { %v787_v40 = vpop.f32.mrf.mxu1  ;;  %v708_v41 = vpop.f32.mrf.mxu0 }
 0x11c   : > { %811 = vst.msk [vmem:[%s2194_s25 + $0x8] sm:$0xff] %vm809_vm1, %v794_v38  ;;  %v788_v42 = vadd.f32 %v787_v40, %v697_v35  ;;  %v709_v43 = vadd.f32 %v708_v41, %v612_v34  ;;  %820 = vrot.lane.b32.xlu1 %v794_v38, %s1972_s12 }
 0x11d   : > { %v1726_v44 = vpop.f32.mrf.mxu1 }
 0x11e   : > { %810 = vst.msk [vmem:[%s2194_s25] sm:$0xff] %vm809_vm1, %v788_v42  ;;  %v806_v45 = vadd.f32 %v1726_v44, %v715_v39  ;;  %818 = vrot.lane.b32.xlu0 %v788_v42, %s1972_s12 }
 0x11f   : > { %v799_v46 = vpop.f32.mrf.mxu1 }
 0x120   : > { %813 = vst.msk [vmem:[%s2194_s25 + $0x18] sm:$0xff] %vm809_vm1, %v806_v45  ;;  %v800_v47 = vadd.f32 %v799_v46, %v709_v43  ;;  %824 = vrot.lane.b32.xlu1 %v806_v45, %s1972_s12 }
 0x122   : > { %812 = vst.msk [vmem:[%s2194_s25 + $0x10] sm:$0xff] %vm809_vm1, %v800_v47  ;;  %822 = vrot.lane.b32.xlu0 %v800_v47, %s1972_s12 }
 0x173   : > { %v1743_v48 = vpop.f32.mrf.mxu1 }
 0x175   : > { %v1035_v49 = vpop.f32.mrf.mxu1 }
 0x177   : > { %v1746_v50 = vpop.f32.mrf.mxu1 }
 0x179   : > { %v1047_v51 = vpop.f32.mrf.mxu1 }
 0x17b   : > { %v1733_v52 = vpop.f32.mrf.mxu0  ;;  %v1763_v53 = vpop.f32.mrf.mxu1 }
 0x17c   : > { %v1042_v61 = vadd.f32 %v1743_v48, %v1733_v52 }
 0x17d   : > { %v924_v54 = vpop.f32.mrf.mxu0  ;;  %v1225_v55 = vpop.f32.mrf.mxu1 }
 0x17e   : > { %v1036_v63 = vadd.f32 %v1035_v49, %v924_v54 }
 0x17f   : > { %v1736_v56 = vpop.f32.mrf.mxu0  ;;  %v1766_v57 = vpop.f32.mrf.mxu1 }
 0x180   : > { %v1054_v3 = vadd.f32 %v1746_v50, %v1736_v56 }
 0x181   : > { %v944_v58 = vpop.f32.mrf.mxu0  ;;  %v1241_v59 = vpop.f32.mrf.mxu1 }
 0x182   : > { %v1048_v6 = vadd.f32 %v1047_v51, %v944_v58 }
 0x183   : > { %v1753_v60 = vpop.f32.mrf.mxu0  ;;  %v1783_v1 = vpop.f32.mrf.mxu1 }
 0x184   : > { %v1137_v0 = vadd.f32 %v1753_v60, %v1042_v61 }
 0x185   : > { %v1129_v62 = vpop.f32.mrf.mxu0  ;;  %v1417_v9 = vpop.f32.mrf.mxu1 }
 0x186   : > { %v1130_v4 = vadd.f32 %v1129_v62, %v1036_v63  ;;  %v1234_v8 = vadd.f32 %v1763_v53, %v1137_v0 }
 0x187   : > { %v1756_v2 = vpop.f32.mrf.mxu0  ;;  %v1786_v19 = vpop.f32.mrf.mxu1 }
 0x188   : > { %v1151_v7 = vadd.f32 %v1756_v2, %v1054_v3  ;;  %v1226_v13 = vadd.f32 %v1225_v55, %v1130_v4 }
 0x189   : > { %v1143_v5 = vpop.f32.mrf.mxu0  ;;  %v1429_v29 = vpop.f32.mrf.mxu1 }
 0x18a   : > { %v1144_v11 = vadd.f32 %v1143_v5, %v1048_v6  ;;  %v1250_v17 = vadd.f32 %v1766_v57, %v1151_v7 }
 0x18b   : > { %v1773_v10 = vpop.f32.mrf.mxu0 }
 0x18c   : > { %v1333_v12 = vadd.f32 %v1773_v10, %v1234_v8  ;;  %v1242_v23 = vadd.f32 %v1241_v59, %v1144_v11 }
 0x18d   : > { %v1326_v14 = vpop.f32.mrf.mxu0 }
 0x18e   : > { %v1424_v15 = vadd.f32 %v1783_v1, %v1333_v12  ;;  %v1327_v16 = vadd.f32 %v1326_v14, %v1226_v13  ;;  %v821_v18 = vpop.permute.xlu1 %820 }
 0x18f   : > { %v1776_v20 = vpop.f32.mrf.mxu0  ;;  %1580 = vst.msk [vmem:[%s2194_s25 + $0x28] sm:$0xff] %vm809_vm1, %v821_v18 }
 0x190   : > { %1584 = vst.msk [vmem:[%s2194_s25 + $0x48] sm:$0xff] %vm809_vm1, %v1424_v15  ;;  %v1418_v21 = vadd.f32 %v1417_v9, %v1327_v16  ;;  %v1345_v22 = vadd.f32 %v1776_v20, %v1250_v17  ;;  %1450 = vrot.lane.b32.xlu1 %v1424_v15, %s1972_s12  ;;  %v819_v24 = vpop.permute.xlu0 %818 }
 0x191   : > { %v1338_v25 = vpop.f32.mrf.mxu0  ;;  %1579 = vst.msk [vmem:[%s2194_s25 + $0x20] sm:$0xff] %vm809_vm1, %v819_v24 }
 0x192   : > { %1583 = vst.msk [vmem:[%s2194_s25 + $0x40] sm:$0xff] %vm809_vm1, %v1418_v21  ;;  %v1436_v26 = vadd.f32 %v1786_v19, %v1345_v22  ;;  %v1339_v27 = vadd.f32 %v1338_v25, %v1242_v23  ;;  %1448 = vrot.lane.b32.xlu0 %v1418_v21, %s1972_s12  ;;  %v825_v28 = vpop.permute.xlu1 %824 }
 0x193   : > { %1582 = vst.msk [vmem:[%s2194_s25 + $0x38] sm:$0xff] %vm809_vm1, %v825_v28 }
 0x194   : > { %1586 = vst.msk [vmem:[%s2194_s25 + $0x58] sm:$0xff] %vm809_vm1, %v1436_v26  ;;  %v1430_v30 = vadd.f32 %v1429_v29, %v1339_v27  ;;  %1454 = vrot.lane.b32.xlu1 %v1436_v26, %s1972_s12  ;;  %v823_v31 = vpop.permute.xlu0 %822 }
 0x195   : > { %1581 = vst.msk [vmem:[%s2194_s25 + $0x30] sm:$0xff] %vm809_vm1, %v823_v31 }
 0x196   : > { %1585 = vst.msk [vmem:[%s2194_s25 + $0x50] sm:$0xff] %vm809_vm1, %v1430_v30  ;;  %1452 = vrot.lane.b32.xlu0 %v1430_v30, %s1972_s12 }
 0x202   : > { %v1451_v32 = vpop.permute.xlu1 %1450 }
 0x203   : > { %1588 = vst.msk [vmem:[%s2194_s25 + $0x68] sm:$0xff] %vm809_vm1, %v1451_v32 }
 0x204   : > { %v1449_v33 = vpop.permute.xlu0 %1448 }
 0x205   : > { %1587 = vst.msk [vmem:[%s2194_s25 + $0x60] sm:$0xff] %vm809_vm1, %v1449_v33 }
 0x206   : > { %v1455_v34 = vpop.permute.xlu1 %1454 }
 0x207   : > { %1590 = vst.msk [vmem:[%s2194_s25 + $0x78] sm:$0xff] %vm809_vm1, %v1455_v34 }
 0x208   : > { %v1453_v35 = vpop.permute.xlu0 %1452 }
 0x209   : > { %1589 = vst.msk [vmem:[%s2194_s25 + $0x70] sm:$0xff] %vm809_vm1, %v1453_v35 }
 0x20a PF: > { %s16_s14 = sadd.s32 1, %s1965_s14   ;;  %s2262_s9 = smov %s1949_s10 }
 0x20b   : > { %p13_p4 = scmp.ge.s32.totalorder %s16_s14, 4   ;;  %s2263_s10 = smov %s1953_s11 }
 0x20c   : > { %s2264_s11 = smov %s2065_s5  ;;  %s2265_s12 = smov %s1961_s13 }
 0x20d   : > { %s2266_s13 = smov %s2268_s22  ;;  %15 = sbr.rel (!%p13_p4) target bundleno = 5 (0x5), region = 75 }
 0x212   :  { %1492 = vsyncpa [#allocation3], 1 }
 0x213   :  { %1494 = vsyncpa [#allocation3 + $0x1], 1 }
 0x214   :  { %1495 = vsyncpa [#allocation5], 1 }

</bundles_post_ra>
